<compile_context>
chip_gen: v7x
topology: tpu7x:2x2x1
jax: 0.10.0
libtpu: 0.0.40
codegen_flags: <defaults>
</compile_context>

<pallas_src>
import numpy as np
import jax
import jax.numpy as jnp
from jax.experimental import pallas as pl
from jax.experimental.pallas import tpu as pltpu

# ---- hyper-parameters mirroring the PyTorch script -------------------------
HP = {'kernel_size': 3, 'embedding_dimension': 8, 'depth': 4, 'in_dim': 3}
N_IN = HP['in_dim']                      # n = 3
FEAT_IN = N_IN * (N_IN + 1)              # 12 : MLP input features
LAYER_SIZE = max(FEAT_IN, 10)            # 12
EM_DIM = HP['embedding_dimension']       # em_dim (= sys.argv[2] in the script)
C = 4                                    # post_code channels
L = 16                                   # post_code length
K = HP['kernel_size']                    # 3
DEPTH = HP['depth']                      # 4 decoder conv layers
OUT_DIM = N_IN * L                       # 48

PAD = 128                                # lane-dense padded feature width
TILE_B = 128                             # batch tile for the gridded path

# activation pattern over the *unfused* chain (reference):
#   mlp: 6 Linear, LeakyReLU after the first 5
#   linear2: no activation
#   decoder: DEPTH convs, LeakyReLU after all but the last
ACT = [True] * 5 + [False] + [False] + [True] * (DEPTH - 1) + [False]   # len 11

# fused chain: layers 5,6,7 (no activation between them, LeakyReLU after 7) -> one layer
ACT_FUSED = tuple(ACT[:5] + [ACT[7]] + ACT[8:])                          # len 9
N_LAYERS = len(ACT_FUSED)                                                # 9


def _leaky_relu(x):
    return jnp.where(x > 0, x, 0.01 * x)   # PyTorch LeakyReLU default slope 0.01


# ---- Pallas kernel: the whole (fused) forward is one chain of matmuls -------
def encoder_map_kernel(x_ref, w_ref, b_ref, o_ref):
    # x_ref : (B_tile, PAD) f32   (features zero-padded to 128 lanes)
    # w_ref : (N_LAYERS, PAD, PAD) f32  zero-padded weight slab
    # b_ref : (N_LAYERS, 1, PAD)  f32  zero-padded bias slab
    h = x_ref[...]
    for i in range(N_LAYERS):                       # unrolled at trace time
        h = jnp.dot(h, w_ref[i], preferred_element_type=jnp.float32) + b_ref[i]
        if ACT_FUSED[i]:
            h = _leaky_relu(h)
    o_ref[...] = h


# ---- parameter setup (plain JAX / numpy glue) -------------------------------
def conv1d_to_dense(w, length):
    """Fold a PyTorch-style Conv1d weight (C_out, C_in, K), padding=(K-1)//2,
    stride=1, into a dense matrix M of shape (C_in*L, C_out*L) such that
    y_flat = x_flat @ M  reproduces the convolution on row-major (C, L) flats."""
    cout, cin, k = w.shape
    pad = (k - 1) // 2
    M = np.zeros((cin * length, cout * length), dtype=np.float32)
    for o in range(cout):
        for c in range(cin):
            for lo in range(length):
                for kk in range(k):
                    li = lo + kk - pad
                    if 0 <= li < length:
                        M[c * length + li, o * length + lo] = w[o, c, kk]
    return M


def make_params(key):
    """Deterministic synthetic parameters (unfused). Returns [(W(in,out), b(1,out))]."""
    params = []
    lin_dims = ([(FEAT_IN, LAYER_SIZE)] + [(LAYER_SIZE, LAYER_SIZE)] * 4 +
                [(LAYER_SIZE, EM_DIM)] +          # mlp (6 Linear layers)
                [(EM_DIM, C * L)])                # linear2
    keys = jax.random.split(key, len(lin_dims) + DEPTH)
    for i, (din, dout) in enumerate(lin_dims):
        k1, k2 = jax.random.split(keys[i])
        w = jax.random.normal(k1, (din, dout), jnp.float32) / np.sqrt(din)
        b = jax.random.normal(k2, (1, dout), jnp.float32) * 0.01
        params.append((w, b))
    # decoder: DEPTH Conv1d layers, channels C -> C -> C -> N_IN
    chans = [C] * DEPTH + [N_IN]
    for i in range(DEPTH):
        k1, k2 = jax.random.split(keys[len(lin_dims) + i])
        cin, cout = chans[i], chans[i + 1]
        w = jax.random.normal(k1, (cout, cin, K), jnp.float32) / np.sqrt(cin * K)
        b = jax.random.normal(k2, (cout,), jnp.float32) * 0.01
        M = conv1d_to_dense(np.asarray(w), L)                  # (cin*L, cout*L)
        bvec = np.repeat(np.asarray(b), L)[None, :]            # (1, cout*L)
        params.append((jnp.asarray(M), jnp.asarray(bvec)))
    return params


def fuse_and_pack(params):
    """Fuse the no-activation boundary (layers 5,6,7) in float64 and pack everything
    into two zero-padded slabs: w_slab (N_LAYERS, PAD, PAD), b_slab (N_LAYERS, 1, PAD)."""
    Ws = [np.asarray(w, np.float64) for w, _ in params]
    bs = [np.asarray(b, np.float64).reshape(1, -1) for _, b in params]
    Wf = Ws[5] @ Ws[6] @ Ws[7]
    bf = (bs[5] @ Ws[6] + bs[6]) @ Ws[7] + bs[7]
    fused_W = Ws[:5] + [Wf] + Ws[8:]
    fused_b = bs[:5] + [bf] + bs[8:]
    assert len(fused_W) == N_LAYERS
    w_slab = np.zeros((N_LAYERS, PAD, PAD), np.float32)
    b_slab = np.zeros((N_LAYERS, 1, PAD), np.float32)
    for i, (w, b) in enumerate(zip(fused_W, fused_b)):
        din, dout = w.shape
        w_slab[i, :din, :dout] = w.astype(np.float32)
        b_slab[i, 0, :dout] = b.reshape(-1).astype(np.float32)
    return jnp.asarray(w_slab), jnp.asarray(b_slab)


# ---- wrapper ----------------------------------------------------------------
@jax.jit
def encoder_map_forward(x, w_slab, b_slab):
    B = x.shape[0]
    if B <= TILE_B:
        # small batch: single tile, grid-less call (no pipeline bookkeeping)
        Bp = max(8, ((B + 7) // 8) * 8)
        x_pad = jnp.zeros((Bp, PAD), jnp.float32).at[:B, :FEAT_IN].set(x)
        y = pl.pallas_call(
            encoder_map_kernel,
            out_shape=jax.ShapeDtypeStruct((Bp, PAD), jnp.float32),
        )(x_pad, w_slab, b_slab)
    else:
        # large batch: tile the batch over a parallel grid axis, weights resident
        Bp = ((B + TILE_B - 1) // TILE_B) * TILE_B
        x_pad = jnp.zeros((Bp, PAD), jnp.float32).at[:B, :FEAT_IN].set(x)
        y = pl.pallas_call(
            encoder_map_kernel,
            grid=(Bp // TILE_B,),
            in_specs=[
                pl.BlockSpec((TILE_B, PAD), lambda i: (i, 0)),
                pl.BlockSpec((N_LAYERS, PAD, PAD), lambda i: (0, 0, 0)),
                pl.BlockSpec((N_LAYERS, 1, PAD), lambda i: (0, 0, 0)),
            ],
            out_specs=pl.BlockSpec((TILE_B, PAD), lambda i: (i, 0)),
            out_shape=jax.ShapeDtypeStruct((Bp, PAD), jnp.float32),
            compiler_params=pltpu.CompilerParams(
                dimension_semantics=("parallel",)),
        )(x_pad, w_slab, b_slab)
    # X_hat in NCL layout, like Conv1d output
    return y[:B, :OUT_DIM].reshape(B, N_IN, L)


# ---- pure-JAX reference (unfused, for correctness check) --------------------
def reference_forward(x, params):
    h = x
    for i, (w, b) in enumerate(params):
        h = h @ w + b
        if ACT[i]:
            h = jnp.where(h > 0, h, 0.01 * h)
    return h.reshape(x.shape[0], N_IN, L)


if __name__ == "__main__":
    key = jax.random.PRNGKey(0)
    kx, kp, kx2 = jax.random.split(key, 3)
    params = make_params(kp)                    # unfused (PyTorch-equivalent) params
    w_slab, b_slab = fuse_and_pack(params)      # fused + packed slabs for the kernel

    # --- small-batch (grid-less) path ---
    B = 8
    x = jax.random.normal(kx, (B, FEAT_IN), jnp.float32)   # X: (B, n*(n+1)) = (8, 12)
    y = encoder_map_forward(x, w_slab, b_slab)
    jax.block_until_ready(y)
    y_ref = reference_forward(x, params)
    assert y.shape == (B, N_IN, L)
    np.testing.assert_allclose(np.asarray(y), np.asarray(y_ref), atol=2e-4, rtol=2e-4)

    # --- batch-tiled (gridded, core-parallel) path ---
    B2 = 256
    x2 = jax.random.normal(kx2, (B2, FEAT_IN), jnp.float32)
    y2 = encoder_map_forward(x2, w_slab, b_slab)
    jax.block_until_ready(y2)
    y2_ref = reference_forward(x2, params)
    assert y2.shape == (B2, N_IN, L)
    np.testing.assert_allclose(np.asarray(y2), np.asarray(y2_ref), atol=2e-4, rtol=2e-4)

    print("KERNEL_OK")
</pallas_src>

<mosaic_0001>
module attributes {stable_mosaic.version = 11 : i64} {
  func.func @encoder_map_kernel(%arg0: memref<8x128xf32, #tpu.memory_space<vmem>>, %arg1: memref<9x128x128xf32, #tpu.memory_space<vmem>>, %arg2: memref<9x1x128xf32, #tpu.memory_space<vmem>>, %arg3: memref<8x128xf32, #tpu.memory_space<vmem>>) attributes {dimension_semantics = [], scalar_prefetch = 0 : i64, scratch_operands = 0 : i64, tpu.core_type = #tpu.core_type<tc>} {
    %c0 = arith.constant 0 : index
    %c0_0 = arith.constant 0 : index
    %0 = vector.load %arg0[%c0, %c0_0] : memref<8x128xf32, #tpu.memory_space<vmem>>, vector<8x128xf32>
    %c0_1 = arith.constant 0 : index
    %c0_2 = arith.constant 0 : index
    %c0_3 = arith.constant 0 : index
    %1 = vector.load %arg1[%c0_1, %c0_2, %c0_3] : memref<9x128x128xf32, #tpu.memory_space<vmem>>, vector<1x128x128xf32>
    %2 = vector.shape_cast %1 : vector<1x128x128xf32> to vector<128x128xf32>
    %cst = arith.constant dense<0.000000e+00> : vector<8x128xf32>
    %3 = tpu.matmul %0, %2, %cst {dimension_numbers = #tpu.dot_dimension_numbers<[1], [0], [0], [1], [0, 0, 1, 1], [], []>} : vector<8x128xf32>, vector<128x128xf32>, vector<8x128xf32> -> vector<8x128xf32>
    %c0_4 = arith.constant 0 : index
    %c0_5 = arith.constant 0 : index
    %c0_6 = arith.constant 0 : index
    %4 = vector.load %arg2[%c0_4, %c0_5, %c0_6] : memref<9x1x128xf32, #tpu.memory_space<vmem>>, vector<1x1x128xf32>
    %5 = vector.shape_cast %4 : vector<1x1x128xf32> to vector<1x128xf32>
    %6 = vector.broadcast %5 : vector<1x128xf32> to vector<8x128xf32>
    %7 = arith.addf %3, %6 : vector<8x128xf32>
    %cst_7 = arith.constant 0.000000e+00 : f32
    %8 = vector.broadcast %cst_7 : f32 to vector<8x128xf32>
    %9 = arith.cmpf ogt, %7, %8 : vector<8x128xf32>
    %cst_8 = arith.constant 0.00999999977 : f32
    %10 = vector.broadcast %cst_8 : f32 to vector<8x128xf32>
    %11 = arith.mulf %10, %7 : vector<8x128xf32>
    %12 = arith.select %9, %7, %11 : vector<8x128xi1>, vector<8x128xf32>
    %c1 = arith.constant 1 : index
    %c0_9 = arith.constant 0 : index
    %c0_10 = arith.constant 0 : index
    %13 = vector.load %arg1[%c1, %c0_9, %c0_10] : memref<9x128x128xf32, #tpu.memory_space<vmem>>, vector<1x128x128xf32>
    %14 = vector.shape_cast %13 : vector<1x128x128xf32> to vector<128x128xf32>
    %cst_11 = arith.constant dense<0.000000e+00> : vector<8x128xf32>
    %15 = tpu.matmul %12, %14, %cst_11 {dimension_numbers = #tpu.dot_dimension_numbers<[1], [0], [0], [1], [0, 0, 1, 1], [], []>} : vector<8x128xf32>, vector<128x128xf32>, vector<8x128xf32> -> vector<8x128xf32>
    %c1_12 = arith.constant 1 : index
    %c0_13 = arith.constant 0 : index
    %c0_14 = arith.constant 0 : index
    %16 = vector.load %arg2[%c1_12, %c0_13, %c0_14] : memref<9x1x128xf32, #tpu.memory_space<vmem>>, vector<1x1x128xf32>
    %17 = vector.shape_cast %16 : vector<1x1x128xf32> to vector<1x128xf32>
    %18 = vector.broadcast %17 : vector<1x128xf32> to vector<8x128xf32>
    %19 = arith.addf %15, %18 : vector<8x128xf32>
    %cst_15 = arith.constant 0.000000e+00 : f32
    %20 = vector.broadcast %cst_15 : f32 to vector<8x128xf32>
    %21 = arith.cmpf ogt, %19, %20 : vector<8x128xf32>
    %cst_16 = arith.constant 0.00999999977 : f32
    %22 = vector.broadcast %cst_16 : f32 to vector<8x128xf32>
    %23 = arith.mulf %22, %19 : vector<8x128xf32>
    %24 = arith.select %21, %19, %23 : vector<8x128xi1>, vector<8x128xf32>
    %c2 = arith.constant 2 : index
    %c0_17 = arith.constant 0 : index
    %c0_18 = arith.constant 0 : index
    %25 = vector.load %arg1[%c2, %c0_17, %c0_18] : memref<9x128x128xf32, #tpu.memory_space<vmem>>, vector<1x128x128xf32>
    %26 = vector.shape_cast %25 : vector<1x128x128xf32> to vector<128x128xf32>
    %cst_19 = arith.constant dense<0.000000e+00> : vector<8x128xf32>
    %27 = tpu.matmul %24, %26, %cst_19 {dimension_numbers = #tpu.dot_dimension_numbers<[1], [0], [0], [1], [0, 0, 1, 1], [], []>} : vector<8x128xf32>, vector<128x128xf32>, vector<8x128xf32> -> vector<8x128xf32>
    %c2_20 = arith.constant 2 : index
    %c0_21 = arith.constant 0 : index
    %c0_22 = arith.constant 0 : index
    %28 = vector.load %arg2[%c2_20, %c0_21, %c0_22] : memref<9x1x128xf32, #tpu.memory_space<vmem>>, vector<1x1x128xf32>
    %29 = vector.shape_cast %28 : vector<1x1x128xf32> to vector<1x128xf32>
    %30 = vector.broadcast %29 : vector<1x128xf32> to vector<8x128xf32>
    %31 = arith.addf %27, %30 : vector<8x128xf32>
    %cst_23 = arith.constant 0.000000e+00 : f32
    %32 = vector.broadcast %cst_23 : f32 to vector<8x128xf32>
    %33 = arith.cmpf ogt, %31, %32 : vector<8x128xf32>
    %cst_24 = arith.constant 0.00999999977 : f32
    %34 = vector.broadcast %cst_24 : f32 to vector<8x128xf32>
    %35 = arith.mulf %34, %31 : vector<8x128xf32>
    %36 = arith.select %33, %31, %35 : vector<8x128xi1>, vector<8x128xf32>
    %c3 = arith.constant 3 : index
    %c0_25 = arith.constant 0 : index
    %c0_26 = arith.constant 0 : index
    %37 = vector.load %arg1[%c3, %c0_25, %c0_26] : memref<9x128x128xf32, #tpu.memory_space<vmem>>, vector<1x128x128xf32>
    %38 = vector.shape_cast %37 : vector<1x128x128xf32> to vector<128x128xf32>
    %cst_27 = arith.constant dense<0.000000e+00> : vector<8x128xf32>
    %39 = tpu.matmul %36, %38, %cst_27 {dimension_numbers = #tpu.dot_dimension_numbers<[1], [0], [0], [1], [0, 0, 1, 1], [], []>} : vector<8x128xf32>, vector<128x128xf32>, vector<8x128xf32> -> vector<8x128xf32>
    %c3_28 = arith.constant 3 : index
    %c0_29 = arith.constant 0 : index
    %c0_30 = arith.constant 0 : index
    %40 = vector.load %arg2[%c3_28, %c0_29, %c0_30] : memref<9x1x128xf32, #tpu.memory_space<vmem>>, vector<1x1x128xf32>
    %41 = vector.shape_cast %40 : vector<1x1x128xf32> to vector<1x128xf32>
    %42 = vector.broadcast %41 : vector<1x128xf32> to vector<8x128xf32>
    %43 = arith.addf %39, %42 : vector<8x128xf32>
    %cst_31 = arith.constant 0.000000e+00 : f32
    %44 = vector.broadcast %cst_31 : f32 to vector<8x128xf32>
    %45 = arith.cmpf ogt, %43, %44 : vector<8x128xf32>
    %cst_32 = arith.constant 0.00999999977 : f32
    %46 = vector.broadcast %cst_32 : f32 to vector<8x128xf32>
    %47 = arith.mulf %46, %43 : vector<8x128xf32>
    %48 = arith.select %45, %43, %47 : vector<8x128xi1>, vector<8x128xf32>
    %c4 = arith.constant 4 : index
    %c0_33 = arith.constant 0 : index
    %c0_34 = arith.constant 0 : index
    %49 = vector.load %arg1[%c4, %c0_33, %c0_34] : memref<9x128x128xf32, #tpu.memory_space<vmem>>, vector<1x128x128xf32>
    %50 = vector.shape_cast %49 : vector<1x128x128xf32> to vector<128x128xf32>
    %cst_35 = arith.constant dense<0.000000e+00> : vector<8x128xf32>
    %51 = tpu.matmul %48, %50, %cst_35 {dimension_numbers = #tpu.dot_dimension_numbers<[1], [0], [0], [1], [0, 0, 1, 1], [], []>} : vector<8x128xf32>, vector<128x128xf32>, vector<8x128xf32> -> vector<8x128xf32>
    %c4_36 = arith.constant 4 : index
    %c0_37 = arith.constant 0 : index
    %c0_38 = arith.constant 0 : index
    %52 = vector.load %arg2[%c4_36, %c0_37, %c0_38] : memref<9x1x128xf32, #tpu.memory_space<vmem>>, vector<1x1x128xf32>
    %53 = vector.shape_cast %52 : vector<1x1x128xf32> to vector<1x128xf32>
    %54 = vector.broadcast %53 : vector<1x128xf32> to vector<8x128xf32>
    %55 = arith.addf %51, %54 : vector<8x128xf32>
    %cst_39 = arith.constant 0.000000e+00 : f32
    %56 = vector.broadcast %cst_39 : f32 to vector<8x128xf32>
    %57 = arith.cmpf ogt, %55, %56 : vector<8x128xf32>
    %cst_40 = arith.constant 0.00999999977 : f32
    %58 = vector.broadcast %cst_40 : f32 to vector<8x128xf32>
    %59 = arith.mulf %58, %55 : vector<8x128xf32>
    %60 = arith.select %57, %55, %59 : vector<8x128xi1>, vector<8x128xf32>
    %c5 = arith.constant 5 : index
    %c0_41 = arith.constant 0 : index
    %c0_42 = arith.constant 0 : index
    %61 = vector.load %arg1[%c5, %c0_41, %c0_42] : memref<9x128x128xf32, #tpu.memory_space<vmem>>, vector<1x128x128xf32>
    %62 = vector.shape_cast %61 : vector<1x128x128xf32> to vector<128x128xf32>
    %cst_43 = arith.constant dense<0.000000e+00> : vector<8x128xf32>
    %63 = tpu.matmul %60, %62, %cst_43 {dimension_numbers = #tpu.dot_dimension_numbers<[1], [0], [0], [1], [0, 0, 1, 1], [], []>} : vector<8x128xf32>, vector<128x128xf32>, vector<8x128xf32> -> vector<8x128xf32>
    %c5_44 = arith.constant 5 : index
    %c0_45 = arith.constant 0 : index
    %c0_46 = arith.constant 0 : index
    %64 = vector.load %arg2[%c5_44, %c0_45, %c0_46] : memref<9x1x128xf32, #tpu.memory_space<vmem>>, vector<1x1x128xf32>
    %65 = vector.shape_cast %64 : vector<1x1x128xf32> to vector<1x128xf32>
    %66 = vector.broadcast %65 : vector<1x128xf32> to vector<8x128xf32>
    %67 = arith.addf %63, %66 : vector<8x128xf32>
    %cst_47 = arith.constant 0.000000e+00 : f32
    %68 = vector.broadcast %cst_47 : f32 to vector<8x128xf32>
    %69 = arith.cmpf ogt, %67, %68 : vector<8x128xf32>
    %cst_48 = arith.constant 0.00999999977 : f32
    %70 = vector.broadcast %cst_48 : f32 to vector<8x128xf32>
    %71 = arith.mulf %70, %67 : vector<8x128xf32>
    %72 = arith.select %69, %67, %71 : vector<8x128xi1>, vector<8x128xf32>
    %c6 = arith.constant 6 : index
    %c0_49 = arith.constant 0 : index
    %c0_50 = arith.constant 0 : index
    %73 = vector.load %arg1[%c6, %c0_49, %c0_50] : memref<9x128x128xf32, #tpu.memory_space<vmem>>, vector<1x128x128xf32>
    %74 = vector.shape_cast %73 : vector<1x128x128xf32> to vector<128x128xf32>
    %cst_51 = arith.constant dense<0.000000e+00> : vector<8x128xf32>
    %75 = tpu.matmul %72, %74, %cst_51 {dimension_numbers = #tpu.dot_dimension_numbers<[1], [0], [0], [1], [0, 0, 1, 1], [], []>} : vector<8x128xf32>, vector<128x128xf32>, vector<8x128xf32> -> vector<8x128xf32>
    %c6_52 = arith.constant 6 : index
    %c0_53 = arith.constant 0 : index
    %c0_54 = arith.constant 0 : index
    %76 = vector.load %arg2[%c6_52, %c0_53, %c0_54] : memref<9x1x128xf32, #tpu.memory_space<vmem>>, vector<1x1x128xf32>
    %77 = vector.shape_cast %76 : vector<1x1x128xf32> to vector<1x128xf32>
    %78 = vector.broadcast %77 : vector<1x128xf32> to vector<8x128xf32>
    %79 = arith.addf %75, %78 : vector<8x128xf32>
    %cst_55 = arith.constant 0.000000e+00 : f32
    %80 = vector.broadcast %cst_55 : f32 to vector<8x128xf32>
    %81 = arith.cmpf ogt, %79, %80 : vector<8x128xf32>
    %cst_56 = arith.constant 0.00999999977 : f32
    %82 = vector.broadcast %cst_56 : f32 to vector<8x128xf32>
    %83 = arith.mulf %82, %79 : vector<8x128xf32>
    %84 = arith.select %81, %79, %83 : vector<8x128xi1>, vector<8x128xf32>
    %c7 = arith.constant 7 : index
    %c0_57 = arith.constant 0 : index
    %c0_58 = arith.constant 0 : index
    %85 = vector.load %arg1[%c7, %c0_57, %c0_58] : memref<9x128x128xf32, #tpu.memory_space<vmem>>, vector<1x128x128xf32>
    %86 = vector.shape_cast %85 : vector<1x128x128xf32> to vector<128x128xf32>
    %cst_59 = arith.constant dense<0.000000e+00> : vector<8x128xf32>
    %87 = tpu.matmul %84, %86, %cst_59 {dimension_numbers = #tpu.dot_dimension_numbers<[1], [0], [0], [1], [0, 0, 1, 1], [], []>} : vector<8x128xf32>, vector<128x128xf32>, vector<8x128xf32> -> vector<8x128xf32>
    %c7_60 = arith.constant 7 : index
    %c0_61 = arith.constant 0 : index
    %c0_62 = arith.constant 0 : index
    %88 = vector.load %arg2[%c7_60, %c0_61, %c0_62] : memref<9x1x128xf32, #tpu.memory_space<vmem>>, vector<1x1x128xf32>
    %89 = vector.shape_cast %88 : vector<1x1x128xf32> to vector<1x128xf32>
    %90 = vector.broadcast %89 : vector<1x128xf32> to vector<8x128xf32>
    %91 = arith.addf %87, %90 : vector<8x128xf32>
    %cst_63 = arith.constant 0.000000e+00 : f32
    %92 = vector.broadcast %cst_63 : f32 to vector<8x128xf32>
    %93 = arith.cmpf ogt, %91, %92 : vector<8x128xf32>
    %cst_64 = arith.constant 0.00999999977 : f32
    %94 = vector.broadcast %cst_64 : f32 to vector<8x128xf32>
    %95 = arith.mulf %94, %91 : vector<8x128xf32>
    %96 = arith.select %93, %91, %95 : vector<8x128xi1>, vector<8x128xf32>
    %c8 = arith.constant 8 : index
    %c0_65 = arith.constant 0 : index
    %c0_66 = arith.constant 0 : index
    %97 = vector.load %arg1[%c8, %c0_65, %c0_66] : memref<9x128x128xf32, #tpu.memory_space<vmem>>, vector<1x128x128xf32>
    %98 = vector.shape_cast %97 : vector<1x128x128xf32> to vector<128x128xf32>
    %cst_67 = arith.constant dense<0.000000e+00> : vector<8x128xf32>
    %99 = tpu.matmul %96, %98, %cst_67 {dimension_numbers = #tpu.dot_dimension_numbers<[1], [0], [0], [1], [0, 0, 1, 1], [], []>} : vector<8x128xf32>, vector<128x128xf32>, vector<8x128xf32> -> vector<8x128xf32>
    %c8_68 = arith.constant 8 : index
    %c0_69 = arith.constant 0 : index
    %c0_70 = arith.constant 0 : index
    %100 = vector.load %arg2[%c8_68, %c0_69, %c0_70] : memref<9x1x128xf32, #tpu.memory_space<vmem>>, vector<1x1x128xf32>
    %101 = vector.shape_cast %100 : vector<1x1x128xf32> to vector<1x128xf32>
    %102 = vector.broadcast %101 : vector<1x128xf32> to vector<8x128xf32>
    %103 = arith.addf %99, %102 : vector<8x128xf32>
    %c0_71 = arith.constant 0 : index
    %c0_72 = arith.constant 0 : index
    %104 = vector.load %arg3[%c0_71, %c0_72] : memref<8x128xf32, #tpu.memory_space<vmem>>, vector<8x128xf32>
    tpu.vector_store %arg3[%c0_71, %c0_72], %103 {strides = array<i32>} : memref<8x128xf32, #tpu.memory_space<vmem>>, vector<8x128xf32>,
    return
  }
}

</mosaic_0001>

<bundles_post_ra>
// kernel: encoder_map_forward.1
= control target key start
LH: loop header
LB: loop body
LE: loop exit
PB: predicated region body
PF: predicated region fallthrough
CT: control target
= control target key end

     0   :  { %8 = vsyncpa [#allocation3], 0  ;;  %s1643_s12 = smov [#allocation2]   ;;  %s1804_s0 = inlined_call_operand.vmem [shape: f32[8,128], index: 0, kind: input, shape index: {}]   ;;  %s1805_s1 = inlined_call_operand.hbm [shape: f32[9,128,128], index: 1, kind: input, shape index: {}]   ;;  %s1806_s2 = inlined_call_operand.vmem [shape: f32[9,1,128], index: 2, kind: input, shape index: {}]   ;;  %s1807_s3 = inlined_call_operand.vmem [shape: f32[8,128], index: 3, kind: output, shape index: {}]  }
   0x1   :  { %s16_s13 = sshll.u32 %s1643_s12, 4  ;;  %s1619_s16 = scalar_lea.hbm %s1805_s1, 18432  ;;  %s17_s13 = int_to_ptr.vmem [resolvable:$true] %s16_s13 }
   0x2   :  { %p1620_p0 = scmp.ne.s32.totalorder %s1805_s1, %s1619_s16  ;;  %p1623_p1 = scmp.lt.u32.totalorder %s1619_s16, %s1805_s1 }
   0x4   :  { %p1625_p2 = pnand %p1623_p1, %p1620_p0 }
   0x6   :  { %1628 = shalt.err (!%p1625_p2)
}
   0x7   :  { %s1629_s21 = scalar_lea.vmem %s17_s13, 18432  ;;  %p1634_p4 = scmp.lt.s32.totalorder %s17_s13, %s17_s13 }
   0x8   :  { %p1630_p3 = scmp.ne.s32.totalorder %s17_s13, %s1629_s21  ;;  %p1635_p5 = scmp.lt.s32.totalorder %s1629_s21, %s1629_s21 }
   0xa   :  { %p1636_p6 = por %p1635_p5, %p1634_p4 }
   0xc   :  { %p1637_p7 = pnand %p1636_p6, %p1630_p3 }
   0xe   :  { %1640 = shalt.err (!%p1637_p7)
}
   0xf   :  { %s1644_s22 = smov 128   ;;  %s1645_s23 = smov 8  }
  0x10   :  { %22 = dma.hbm_to_vmem [thread:$0]  %s1805_s1, 18432, %s17_s13, [#allocation3], %s1644_s22, %s1644_s22, %s1645_s23  }
  0x11   :  { %1641 = dma.done.wait [#allocation3], 18432  }
  0x12   :  { %1642 = vsyncadd [#allocation3], 4294948864  ;;  %v1646_v0 = vmov 0.0|0.0   ;;  %vm1647_vm0 = vmmov 0   ;;  %v1648_v1 = vmov 0.0   ;;  %v29_v2 = vld [vmem:[#allocation2] sm:$0xff] }
  0x13   :  { %1397 = vmatprep.subr.bf16.mxu0 %v1646_v0  ;;  %1114 = vmatprep.mubr.msk.f32.mxu0 %vm1647_vm0, %v1648_v1  ;;  %v30_v3 = vld [vmem:[#allocation2 + $0x8] sm:$0xff]  ;;  %v31_v4 = vld [vmem:[#allocation2 + $0x10] sm:$0xff]  ;;  %v32_v6 = vld [vmem:[#allocation2 + $0x18] sm:$0xff] }
  0x14   :  { %1421 = vmatprep.subr.bf16.mxu1 %v1646_v0  ;;  %1149 = vmatprep.mubr.msk.f32.mxu1 %vm1647_vm0, %v1648_v1  ;;  %v1398_v5 = vpack.c.bf16 %v30_v3, %v29_v2  ;;  %v1401_v7 = vpack.c.bf16 %v32_v6, %v31_v4  ;;  %v33_v8 = vld [vmem:[#allocation2 + $0x20] sm:$0xff]  ;;  %v34_v9 = vld [vmem:[#allocation2 + $0x28] sm:$0xff]  ;;  %v128_v12 = vld [vmem:[#allocation2 + $0x90] sm:$0xff] }
  0x15   :  { %v126_v10 = vld [vmem:[#allocation2 + $0x80] sm:$0xff]  ;;  %v127_v11 = vld [vmem:[#allocation2 + $0x88] sm:$0xff]  ;;  %v129_v13 = vld [vmem:[#allocation2 + $0x98] sm:$0xff]  ;;  %v1404_v14 = vpack.c.bf16 %v34_v9, %v33_v8 }
  0x16   :  { %1399 = vmatpush3.bf16.msra.mxu0 %v1398_v5  ;;  %v1422_v15 = vpack.c.bf16 %v127_v11, %v126_v10  ;;  %v35_v16 = vld [vmem:[#allocation2 + $0x30] sm:$0xff]  ;;  %v36_v17 = vld [vmem:[#allocation2 + $0x38] sm:$0xff]  ;;  %v1425_v18 = vpack.c.bf16 %v129_v13, %v128_v12  ;;  %v130_v19 = vld [vmem:[#allocation2 + $0xa0] sm:$0xff] }
  0x17   :  { %1400 = vmatprep.subr.bf16.mxu0 %v1646_v0  ;;  %v131_v20 = vld [vmem:[#allocation2 + $0xa8] sm:$0xff]  ;;  %v1407_v21 = vpack.c.bf16 %v36_v17, %v35_v16  ;;  %v37_v22 = vld [vmem:[#allocation2 + $0x40] sm:$0xff]  ;;  %v132_v25 = vld [vmem:[#allocation2 + $0xb0] sm:$0xff] }
  0x18   :  { %1423 = vmatpush3.bf16.msra.mxu1 %v1422_v15  ;;  %v38_v23 = vld [vmem:[#allocation2 + $0x48] sm:$0xff]  ;;  %v1428_v24 = vpack.c.bf16 %v131_v20, %v130_v19  ;;  %v133_v26 = vld [vmem:[#allocation2 + $0xb8] sm:$0xff]  ;;  %v39_v28 = vld [vmem:[#allocation2 + $0x50] sm:$0xff] }
  0x19   :  { %1424 = vmatprep.subr.bf16.mxu1 %v1646_v0  ;;  %v1410_v27 = vpack.c.bf16 %v38_v23, %v37_v22  ;;  %v40_v29 = vld [vmem:[#allocation2 + $0x58] sm:$0xff]  ;;  %v1431_v30 = vpack.c.bf16 %v133_v26, %v132_v25  ;;  %v134_v31 = vld [vmem:[#allocation2 + $0xc0] sm:$0xff]  ;;  %v135_v32 = vld [vmem:[#allocation2 + $0xc8] sm:$0xff] }
  0x1a   :  { %1402 = vmatpush3.bf16.msra.mxu0 %v1401_v7  ;;  %v1413_v33 = vpack.c.bf16 %v40_v29, %v39_v28  ;;  %v41_v34 = vld [vmem:[#allocation2 + $0x60] sm:$0xff]  ;;  %v42_v35 = vld [vmem:[#allocation2 + $0x68] sm:$0xff]  ;;  %v1434_v36 = vpack.c.bf16 %v135_v32, %v134_v31  ;;  %v136_v37 = vld [vmem:[#allocation2 + $0xd0] sm:$0xff] }
  0x1b   :  { %1403 = vmatprep.subr.bf16.mxu0 %v1646_v0  ;;  %v137_v38 = vld [vmem:[#allocation2 + $0xd8] sm:$0xff]  ;;  %v1416_v39 = vpack.c.bf16 %v42_v35, %v41_v34  ;;  %v43_v40 = vld [vmem:[#allocation2 + $0x70] sm:$0xff]  ;;  %v138_v43 = vld [vmem:[#allocation2 + $0xe0] sm:$0xff] }
  0x1c   :  { %1426 = vmatpush3.bf16.msra.mxu1 %v1425_v18  ;;  %v44_v41 = vld [vmem:[#allocation2 + $0x78] sm:$0xff]  ;;  %v1437_v42 = vpack.c.bf16 %v137_v38, %v136_v37  ;;  %v139_v44 = vld [vmem:[#allocation2 + $0xe8] sm:$0xff]  ;;  %v28_v47 = vld [vmem:[%s1804_s0] sm:$0xff] }
  0x1d   :  { %1427 = vmatprep.subr.bf16.mxu1 %v1646_v0  ;;  %v1419_v45 = vpack.c.bf16 %v44_v41, %v43_v40  ;;  %v1440_v46 = vpack.c.bf16 %v139_v44, %v138_v43  ;;  %v140_v48 = vld [vmem:[#allocation2 + $0xf0] sm:$0xff]  ;;  %v141_v49 = vld [vmem:[#allocation2 + $0xf8] sm:$0xff]  ;;  %v224_v51 = vld [vmem:[#allocation2 + $0x100] sm:$0xff] }
  0x1e   :  { %1405 = vmatpush3.bf16.msra.mxu0 %v1404_v14  ;;  %v1443_v50 = vpack.c.bf16 %v141_v49, %v140_v48  ;;  %v225_v52 = vld [vmem:[#allocation2 + $0x108] sm:$0xff]  ;;  %v226_v53 = vld [vmem:[#allocation2 + $0x110] sm:$0xff]  ;;  %v227_v55 = vld [vmem:[#allocation2 + $0x118] sm:$0xff] }
  0x1f   :  { %1406 = vmatprep.subr.bf16.mxu0 %v1646_v0  ;;  %v1446_v54 = vpack.c.bf16 %v225_v52, %v224_v51  ;;  %v1449_v56 = vpack.c.bf16 %v227_v55, %v226_v53  ;;  %v228_v57 = vld [vmem:[#allocation2 + $0x120] sm:$0xff]  ;;  %v229_v58 = vld [vmem:[#allocation2 + $0x128] sm:$0xff]  ;;  %v230_v60 = vld [vmem:[#allocation2 + $0x130] sm:$0xff] }
  0x20   :  { %1429 = vmatpush3.bf16.msra.mxu1 %v1428_v24  ;;  %v1452_v59 = vpack.c.bf16 %v229_v58, %v228_v57  ;;  %v231_v61 = vld [vmem:[#allocation2 + $0x138] sm:$0xff]  ;;  %v232_v63 = vld [vmem:[#allocation2 + $0x140] sm:$0xff]  ;;  %v233_v2 = vld [vmem:[#allocation2 + $0x148] sm:$0xff] }
  0x21   :  { %1430 = vmatprep.subr.bf16.mxu1 %v1646_v0  ;;  %v1455_v62 = vpack.c.bf16 %v231_v61, %v230_v60  ;;  %v1458_v3 = vpack.c.bf16 %v233_v2, %v232_v63  ;;  %v234_v4 = vld [vmem:[#allocation2 + $0x150] sm:$0xff]  ;;  %v235_v5 = vld [vmem:[#allocation2 + $0x158] sm:$0xff]  ;;  %v236_v7 = vld [vmem:[#allocation2 + $0x160] sm:$0xff] }
  0x22   :  { %1408 = vmatpush3.bf16.msra.mxu0 %v1407_v21  ;;  %v1461_v6 = vpack.c.bf16 %v235_v5, %v234_v4  ;;  %v237_v8 = vld [vmem:[#allocation2 + $0x168] sm:$0xff]  ;;  %v912_v10 = vld [vmem:[%s1806_s2] ss:$0 sm:$0xff]  ;;  %v238_v16 = vld [vmem:[#allocation2 + $0x170] sm:$0xff] }
  0x23   :  { %1409 = vmatprep.subr.bf16.mxu0 %v1646_v0  ;;  %v1464_v9 = vpack.c.bf16 %v237_v8, %v236_v7  ;;  %v239_v17 = vld [vmem:[#allocation2 + $0x178] sm:$0xff]  ;;  %v322_v19 = vld [vmem:[#allocation2 + $0x180] sm:$0xff]  ;;  %v323_v20 = vld [vmem:[#allocation2 + $0x188] sm:$0xff] }
  0x24   :  { %1432 = vmatpush3.bf16.msra.mxu1 %v1431_v30  ;;  %v1467_v18 = vpack.c.bf16 %v239_v17, %v238_v16  ;;  %v324_v21 = vld [vmem:[#allocation2 + $0x190] sm:$0xff]  ;;  %v1470_v22 = vpack.c.bf16 %v323_v20, %v322_v19  ;;  %v325_v23 = vld [vmem:[#allocation2 + $0x198] sm:$0xff]  ;;  %v326_v25 = vld [vmem:[#allocation2 + $0x1a0] sm:$0xff] }
  0x25   :  { %1433 = vmatprep.subr.bf16.mxu1 %v1646_v0  ;;  %v1473_v24 = vpack.c.bf16 %v325_v23, %v324_v21  ;;  %v327_v26 = vld [vmem:[#allocation2 + $0x1a8] sm:$0xff]  ;;  %v328_v28 = vld [vmem:[#allocation2 + $0x1b0] sm:$0xff]  ;;  %v329_v29 = vld [vmem:[#allocation2 + $0x1b8] sm:$0xff] }
  0x26   :  { %1411 = vmatpush3.bf16.msra.mxu0 %v1410_v27  ;;  %v1476_v27 = vpack.c.bf16 %v327_v26, %v326_v25  ;;  %v1479_v30 = vpack.c.bf16 %v329_v29, %v328_v28  ;;  %v330_v31 = vld [vmem:[#allocation2 + $0x1c0] sm:$0xff]  ;;  %v331_v32 = vld [vmem:[#allocation2 + $0x1c8] sm:$0xff]  ;;  %v332_v34 = vld [vmem:[#allocation2 + $0x1d0] sm:$0xff] }
  0x27   :  { %1412 = vmatprep.subr.bf16.mxu0 %v1646_v0  ;;  %v333_v35 = vld [vmem:[#allocation2 + $0x1d8] sm:$0xff]  ;;  %v334_v37 = vld [vmem:[#allocation2 + $0x1e0] sm:$0xff]  ;;  %v335_v38 = vld [vmem:[#allocation2 + $0x1e8] sm:$0xff] }
  0x28   :  { %1435 = vmatpush3.bf16.msra.mxu1 %v1434_v36  ;;  %v1485_v36 = vpack.c.bf16 %v333_v35, %v332_v34  ;;  %v914_v40 = vld [vmem:[%s1806_s2 + $0x1] ss:$0 sm:$0xff]  ;;  %v422_v51 = vld [vmem:[#allocation2 + $0x210] sm:$0xff]  ;;  %v423_v53 = vld [vmem:[#allocation2 + $0x218] sm:$0xff] }
  0x29   :  { %1436 = vmatprep.subr.bf16.mxu1 %v1646_v0  ;;  %v420_v49 = vld [vmem:[#allocation2 + $0x200] sm:$0xff]  ;;  %v426_v58 = vld [vmem:[#allocation2 + $0x230] sm:$0xff]  ;;  %v521_v21 = vld [vmem:[#allocation2 + $0x298] sm:$0xff] }
  0x2a   :  { %1414 = vmatpush3.bf16.msra.mxu0 %v1413_v33  ;;  %v1482_v33 = vpack.c.bf16 %v331_v32, %v330_v31  ;;  %v424_v55 = vld [vmem:[#allocation2 + $0x220] sm:$0xff]  ;;  %v430_v2 = vld [vmem:[#allocation2 + $0x250] sm:$0xff] }
  0x2b   :  { %1415 = vmatprep.subr.bf16.mxu0 %v1646_v0  ;;  %v428_v61 = vld [vmem:[#allocation2 + $0x240] sm:$0xff]  ;;  %v520_v19 = vld [vmem:[#allocation2 + $0x290] sm:$0xff] }
  0x2c   :  { %1438 = vmatpush3.bf16.msra.mxu1 %v1437_v42  ;;  %v432_v5 = vld [vmem:[#allocation2 + $0x260] sm:$0xff]  ;;  %v524_v26 = vld [vmem:[#allocation2 + $0x2b0] sm:$0xff] }
  0x2d   :  { %1439 = vmatprep.subr.bf16.mxu1 %v1646_v0  ;;  %v916_v8 = vld [vmem:[%s1806_s2 + $0x2] ss:$0 sm:$0xff]  ;;  %v528_v32 = vld [vmem:[#allocation2 + $0x2d0] sm:$0xff] }
  0x2e   :  { %1417 = vmatpush3.bf16.msra.mxu0 %v1416_v39  ;;  %v1488_v39 = vpack.c.bf16 %v335_v38, %v334_v37  ;;  %v518_v17 = vld [vmem:[#allocation2 + $0x280] sm:$0xff] }
  0x2f   :  { %1418 = vmatprep.subr.bf16.mxu0 %v1646_v0  ;;  %v522_v23 = vld [vmem:[#allocation2 + $0x2a0] sm:$0xff] }
  0x30   :  { %1441 = vmatpush3.bf16.msra.mxu1 %v1440_v46  ;;  %v336_v46 = vld [vmem:[#allocation2 + $0x1f0] sm:$0xff]  ;;  %v526_v29 = vld [vmem:[#allocation2 + $0x2c0] sm:$0xff] }
  0x31   :  { %1442 = vmatprep.subr.bf16.mxu1 %v1646_v0  ;;  %v530_v35 = vld [vmem:[#allocation2 + $0x2e0] sm:$0xff] }
  0x32   :  { %1420 = vmatpush3.bf16.msra.mxu0 %v1419_v45  ;;  %v918_v38 = vld [vmem:[%s1806_s2 + $0x3] ss:$0 sm:$0xff] }
  0x33   :  { %1445 = vmatprep.subr.bf16.mxu0 %v1646_v0 }
  0x34   :  { %1444 = vmatpush3.bf16.msra.mxu1 %v1443_v50  ;;  %v421_v50 = vld [vmem:[#allocation2 + $0x208] sm:$0xff] }
  0x35   :  { %1115 = vmatmul.mubr.f32.vlgmr.msra.gmra.mrb[0].mxu0 %v28_v47  ;;  %1469 = vmatprep.subr.bf16.mxu1 %v1646_v0  ;;  %v337_v47 = vld [vmem:[#allocation2 + $0x1f8] sm:$0xff]  ;;  %v1494_v52 = vpack.c.bf16 %v421_v50, %v420_v49  ;;  %v618_v49 = vld [vmem:[#allocation2 + $0x310] sm:$0xff] }
  0x36   :  { %1184 = vmatprep.mubr.msk.f32.mxu0 %vm1647_vm0, %v1648_v1  ;;  %1447 = vmatpush3.bf16.msra.mxu0 %v1446_v54  ;;  %v1491_v48 = vpack.c.bf16 %v337_v47, %v336_v46  ;;  %v1497_v54 = vpack.c.bf16 %v423_v53, %v422_v51  ;;  %v616_v47 = vld [vmem:[#allocation2 + $0x300] sm:$0xff]  ;;  %v619_v51 = vld [vmem:[#allocation2 + $0x318] sm:$0xff] }
  0x37   :  { %1448 = vmatprep.subr.bf16.mxu0 %v1646_v0  ;;  %v620_v53 = vld [vmem:[#allocation2 + $0x320] sm:$0xff] }
  0x3a   :  { %1450 = vmatpush3.bf16.msra.mxu0 %v1449_v56  ;;  %v425_v56 = vld [vmem:[#allocation2 + $0x228] sm:$0xff] }
  0x3b   :  { %1451 = vmatprep.subr.bf16.mxu0 %v1646_v0  ;;  %v1500_v57 = vpack.c.bf16 %v425_v56, %v424_v55  ;;  %v622_v56 = vld [vmem:[#allocation2 + $0x330] sm:$0xff] }
  0x3e   :  { %1453 = vmatpush3.bf16.msra.mxu0 %v1452_v59  ;;  %v427_v59 = vld [vmem:[#allocation2 + $0x238] sm:$0xff] }
  0x3f   :  { %1454 = vmatprep.subr.bf16.mxu0 %v1646_v0  ;;  %v1503_v60 = vpack.c.bf16 %v427_v59, %v426_v58  ;;  %v624_v59 = vld [vmem:[#allocation2 + $0x340] sm:$0xff] }
  0x42   :  { %1456 = vmatpush3.bf16.msra.mxu0 %v1455_v62  ;;  %v429_v62 = vld [vmem:[#allocation2 + $0x248] sm:$0xff] }
  0x43   :  { %1457 = vmatprep.subr.bf16.mxu0 %v1646_v0  ;;  %v1506_v63 = vpack.c.bf16 %v429_v62, %v428_v61  ;;  %v626_v62 = vld [vmem:[#allocation2 + $0x350] sm:$0xff] }
  0x46   :  { %1459 = vmatpush3.bf16.msra.mxu0 %v1458_v3  ;;  %v431_v3 = vld [vmem:[#allocation2 + $0x258] sm:$0xff] }
  0x47   :  { %1460 = vmatprep.subr.bf16.mxu0 %v1646_v0  ;;  %v1509_v4 = vpack.c.bf16 %v431_v3, %v430_v2  ;;  %v628_v3 = vld [vmem:[#allocation2 + $0x360] sm:$0xff] }
  0x4a   :  { %1462 = vmatpush3.bf16.msra.mxu0 %v1461_v6  ;;  %v433_v6 = vld [vmem:[#allocation2 + $0x268] sm:$0xff] }
  0x4b   :  { %1463 = vmatprep.subr.bf16.mxu0 %v1646_v0  ;;  %v1512_v7 = vpack.c.bf16 %v433_v6, %v432_v5  ;;  %v920_v6 = vld [vmem:[%s1806_s2 + $0x4] ss:$0 sm:$0xff] }
  0x4e   :  { %1465 = vmatpush3.bf16.msra.mxu0 %v1464_v9 }
  0x4f   :  { %1466 = vmatprep.subr.bf16.mxu0 %v1646_v0 }
  0x52   :  { %1468 = vmatpush3.bf16.msra.mxu0 %v1467_v18  ;;  %v519_v18 = vld [vmem:[#allocation2 + $0x288] sm:$0xff] }
  0x53   :  { %1493 = vmatprep.subr.bf16.mxu0 %v1646_v0  ;;  %v1518_v20 = vpack.c.bf16 %v519_v18, %v518_v17  ;;  %v716_v17 = vld [vmem:[#allocation2 + $0x390] sm:$0xff] }
 0x108   :  { %v118_v11 = vpop.f32.mrb[0].mxu0 }
 0x109   :  { %v119_v12 = vadd.f32 %v912_v10, %v118_v11  ;;  %v1116_v13 = vpop.f32.mrb[1].mxu0 }
 0x10b   :  { %v123_v14 = vmul.f32 0.01, %v119_v12  ;;  %vm122_vm1 = vcmp.gt.f32.partialorder %v119_v12, 0.0 }
 0x10d   :  { %v124_v15 = vsel %vm122_vm1, %v119_v12, %v123_v14  ;;  %v434_v14 = vld [vmem:[#allocation2 + $0x270] sm:$0xff] }
 0x10e   :  { %1150 = vmatmul.mubr.f32.vlgmr.msra.gmra.mrb[0].mxu1 %v124_v15  ;;  %v435_v15 = vld [vmem:[#allocation2 + $0x278] sm:$0xff] }
 0x10f   :  { %1219 = vmatprep.mubr.msk.f32.mxu1 %vm1647_vm0, %v1648_v1  ;;  %1471 = vmatpush3.bf16.msra.mxu1 %v1470_v22  ;;  %v1515_v16 = vpack.c.bf16 %v435_v15, %v434_v14  ;;  %v1521_v22 = vpack.c.bf16 %v521_v21, %v520_v19  ;;  %v714_v15 = vld [vmem:[#allocation2 + $0x380] sm:$0xff]  ;;  %v717_v19 = vld [vmem:[#allocation2 + $0x398] sm:$0xff] }
 0x110   :  { %1472 = vmatprep.subr.bf16.mxu1 %v1646_v0  ;;  %v718_v21 = vld [vmem:[#allocation2 + $0x3a0] sm:$0xff] }
 0x113   :  { %1474 = vmatpush3.bf16.msra.mxu1 %v1473_v24  ;;  %v523_v24 = vld [vmem:[#allocation2 + $0x2a8] sm:$0xff] }
 0x114   :  { %1475 = vmatprep.subr.bf16.mxu1 %v1646_v0  ;;  %v1524_v25 = vpack.c.bf16 %v523_v24, %v522_v23  ;;  %v720_v24 = vld [vmem:[#allocation2 + $0x3b0] sm:$0xff] }
 0x117   :  { %1477 = vmatpush3.bf16.msra.mxu1 %v1476_v27  ;;  %v525_v27 = vld [vmem:[#allocation2 + $0x2b8] sm:$0xff] }
 0x118   :  { %1478 = vmatprep.subr.bf16.mxu1 %v1646_v0  ;;  %v1527_v28 = vpack.c.bf16 %v525_v27, %v524_v26  ;;  %v722_v27 = vld [vmem:[#allocation2 + $0x3c0] sm:$0xff] }
 0x11b   :  { %1480 = vmatpush3.bf16.msra.mxu1 %v1479_v30  ;;  %v527_v30 = vld [vmem:[#allocation2 + $0x2c8] sm:$0xff] }
 0x11c   :  { %1481 = vmatprep.subr.bf16.mxu1 %v1646_v0  ;;  %v1530_v31 = vpack.c.bf16 %v527_v30, %v526_v29  ;;  %v724_v30 = vld [vmem:[#allocation2 + $0x3d0] sm:$0xff] }
 0x11f   :  { %1483 = vmatpush3.bf16.msra.mxu1 %v1482_v33  ;;  %v529_v33 = vld [vmem:[#allocation2 + $0x2d8] sm:$0xff] }
 0x120   :  { %1484 = vmatprep.subr.bf16.mxu1 %v1646_v0  ;;  %v1533_v34 = vpack.c.bf16 %v529_v33, %v528_v32  ;;  %v726_v33 = vld [vmem:[#allocation2 + $0x3e0] sm:$0xff] }
 0x123   :  { %1486 = vmatpush3.bf16.msra.mxu1 %v1485_v36  ;;  %v531_v36 = vld [vmem:[#allocation2 + $0x2e8] sm:$0xff] }
 0x124   :  { %1487 = vmatprep.subr.bf16.mxu1 %v1646_v0  ;;  %v1536_v37 = vpack.c.bf16 %v531_v36, %v530_v35  ;;  %v922_v36 = vld [vmem:[%s1806_s2 + $0x5] ss:$0 sm:$0xff] }
 0x127   :  { %1489 = vmatpush3.bf16.msra.mxu1 %v1488_v39 }
 0x128   :  { %1490 = vmatprep.subr.bf16.mxu1 %v1646_v0 }
 0x12b   :  { %1492 = vmatpush3.bf16.msra.mxu1 %v1491_v48  ;;  %v617_v48 = vld [vmem:[#allocation2 + $0x308] sm:$0xff] }
 0x12c   :  { %1517 = vmatprep.subr.bf16.mxu1 %v1646_v0  ;;  %v1542_v50 = vpack.c.bf16 %v617_v48, %v616_v47  ;;  %v814_v47 = vld [vmem:[#allocation2 + $0x410] sm:$0xff] }
 0x1e1   :  { %v216_v41 = vpop.f32.mrb[0].mxu1 }
 0x1e2   :  { %v217_v42 = vadd.f32 %v914_v40, %v216_v41  ;;  %v1151_v43 = vpop.f32.mrb[1].mxu1 }
 0x1e4   :  { %vm220_vm2 = vcmp.gt.f32.partialorder %v217_v42, 0.0  ;;  %v221_v44 = vmul.f32 0.01, %v217_v42 }
 0x1e6   :  { %v222_v45 = vsel %vm220_vm2, %v217_v42, %v221_v44  ;;  %v532_v44 = vld [vmem:[#allocation2 + $0x2f0] sm:$0xff] }
 0x1e7   :  { %1185 = vmatmul.mubr.f32.vlgmr.msra.gmra.mrb[2].mxu0 %v222_v45  ;;  %v533_v45 = vld [vmem:[#allocation2 + $0x2f8] sm:$0xff] }
 0x1e8   :  { %1254 = vmatprep.mubr.msk.f32.mxu0 %vm1647_vm0, %v1648_v1  ;;  %1495 = vmatpush3.bf16.msra.mxu0 %v1494_v52  ;;  %v1539_v46 = vpack.c.bf16 %v533_v45, %v532_v44  ;;  %v1545_v52 = vpack.c.bf16 %v619_v51, %v618_v49  ;;  %v812_v45 = vld [vmem:[#allocation2 + $0x400] sm:$0xff]  ;;  %v815_v49 = vld [vmem:[#allocation2 + $0x418] sm:$0xff] }
 0x1e9   :  { %1496 = vmatprep.subr.bf16.mxu0 %v1646_v0  ;;  %v816_v51 = vld [vmem:[#allocation2 + $0x420] sm:$0xff] }
 0x1ec   :  { %1498 = vmatpush3.bf16.msra.mxu0 %v1497_v54  ;;  %v621_v54 = vld [vmem:[#allocation2 + $0x328] sm:$0xff] }
 0x1ed   :  { %1499 = vmatprep.subr.bf16.mxu0 %v1646_v0  ;;  %v1548_v55 = vpack.c.bf16 %v621_v54, %v620_v53  ;;  %v819_v54 = vld [vmem:[#allocation2 + $0x438] sm:$0xff] }
 0x1f0   :  { %1501 = vmatpush3.bf16.msra.mxu0 %v1500_v57  ;;  %v623_v57 = vld [vmem:[#allocation2 + $0x338] sm:$0xff] }
 0x1f1   :  { %1502 = vmatprep.subr.bf16.mxu0 %v1646_v0  ;;  %v1551_v58 = vpack.c.bf16 %v623_v57, %v622_v56  ;;  %v820_v56 = vld [vmem:[#allocation2 + $0x440] sm:$0xff]  ;;  %v821_v57 = vld [vmem:[#allocation2 + $0x448] sm:$0xff] }
 0x1f4   :  { %1504 = vmatpush3.bf16.msra.mxu0 %v1503_v60  ;;  %v625_v60 = vld [vmem:[#allocation2 + $0x348] sm:$0xff] }
 0x1f5   :  { %1505 = vmatprep.subr.bf16.mxu0 %v1646_v0  ;;  %v1554_v61 = vpack.c.bf16 %v625_v60, %v624_v59  ;;  %v822_v59 = vld [vmem:[#allocation2 + $0x450] sm:$0xff]  ;;  %v823_v60 = vld [vmem:[#allocation2 + $0x458] sm:$0xff] }
 0x1f8   :  { %1507 = vmatpush3.bf16.msra.mxu0 %v1506_v63  ;;  %v627_v63 = vld [vmem:[#allocation2 + $0x358] sm:$0xff] }
 0x1f9   :  { %1508 = vmatprep.subr.bf16.mxu0 %v1646_v0  ;;  %v1557_v2 = vpack.c.bf16 %v627_v63, %v626_v62  ;;  %v824_v62 = vld [vmem:[#allocation2 + $0x460] sm:$0xff]  ;;  %v825_v63 = vld [vmem:[#allocation2 + $0x468] sm:$0xff] }
 0x1fc   :  { %1510 = vmatpush3.bf16.msra.mxu0 %v1509_v4  ;;  %v629_v4 = vld [vmem:[#allocation2 + $0x368] sm:$0xff] }
 0x1fd   :  { %1511 = vmatprep.subr.bf16.mxu0 %v1646_v0  ;;  %v1560_v5 = vpack.c.bf16 %v629_v4, %v628_v3  ;;  %v924_v3 = vld [vmem:[%s1806_s2 + $0x6] ss:$0 sm:$0xff] }
 0x200   :  { %1513 = vmatpush3.bf16.msra.mxu0 %v1512_v7 }
 0x201   :  { %1514 = vmatprep.subr.bf16.mxu0 %v1646_v0 }
 0x204   :  { %1516 = vmatpush3.bf16.msra.mxu0 %v1515_v16  ;;  %v715_v16 = vld [vmem:[#allocation2 + $0x388] sm:$0xff] }
 0x205   :  { %1541 = vmatprep.subr.bf16.mxu0 %v1646_v0  ;;  %v1566_v18 = vpack.c.bf16 %v715_v16, %v714_v15 }
 0x2ba   :  { %v314_v9 = vpop.f32.mrb[2].mxu0 }
 0x2bb   :  { %v315_v10 = vadd.f32 %v916_v8, %v314_v9  ;;  %v1186_v11 = vpop.f32.mrb[3].mxu0 }
 0x2bd   :  { %vm318_vm3 = vcmp.gt.f32.partialorder %v315_v10, 0.0  ;;  %v319_v12 = vmul.f32 0.01, %v315_v10 }
 0x2bf   :  { %v320_v13 = vsel %vm318_vm3, %v315_v10, %v319_v12  ;;  %v630_v12 = vld [vmem:[#allocation2 + $0x370] sm:$0xff] }
 0x2c0   :  { %1220 = vmatmul.mubr.f32.vlgmr.msra.gmra.mrb[2].mxu1 %v320_v13  ;;  %v631_v13 = vld [vmem:[#allocation2 + $0x378] sm:$0xff] }
 0x2c1   :  { %1289 = vmatprep.mubr.msk.f32.mxu1 %vm1647_vm0, %v1648_v1  ;;  %1519 = vmatpush3.bf16.msra.mxu1 %v1518_v20  ;;  %v1563_v14 = vpack.c.bf16 %v631_v13, %v630_v12  ;;  %v1569_v20 = vpack.c.bf16 %v717_v19, %v716_v17  ;;  %v926_v12 = vld [vmem:[%s1806_s2 + $0x7] ss:$0 sm:$0xff]  ;;  %v928_v17 = vld [vmem:[%s1806_s2 + $0x8] ss:$0 sm:$0xff] }
 0x2c2   :  { %1520 = vmatprep.subr.bf16.mxu1 %v1646_v0 }
 0x2c5   :  { %1522 = vmatpush3.bf16.msra.mxu1 %v1521_v22  ;;  %v719_v22 = vld [vmem:[#allocation2 + $0x3a8] sm:$0xff] }
 0x2c6   :  { %1523 = vmatprep.subr.bf16.mxu1 %v1646_v0  ;;  %v1572_v23 = vpack.c.bf16 %v719_v22, %v718_v21 }
 0x2c9   :  { %1525 = vmatpush3.bf16.msra.mxu1 %v1524_v25  ;;  %v721_v25 = vld [vmem:[#allocation2 + $0x3b8] sm:$0xff] }
 0x2ca   :  { %1526 = vmatprep.subr.bf16.mxu1 %v1646_v0  ;;  %v1575_v26 = vpack.c.bf16 %v721_v25, %v720_v24 }
 0x2cd   :  { %1528 = vmatpush3.bf16.msra.mxu1 %v1527_v28  ;;  %v723_v28 = vld [vmem:[#allocation2 + $0x3c8] sm:$0xff] }
 0x2ce   :  { %1529 = vmatprep.subr.bf16.mxu1 %v1646_v0  ;;  %v1578_v29 = vpack.c.bf16 %v723_v28, %v722_v27 }
 0x2d1   :  { %1531 = vmatpush3.bf16.msra.mxu1 %v1530_v31  ;;  %v725_v31 = vld [vmem:[#allocation2 + $0x3d8] sm:$0xff] }
 0x2d2   :  { %1532 = vmatprep.subr.bf16.mxu1 %v1646_v0  ;;  %v1581_v32 = vpack.c.bf16 %v725_v31, %v724_v30 }
 0x2d5   :  { %1534 = vmatpush3.bf16.msra.mxu1 %v1533_v34  ;;  %v727_v34 = vld [vmem:[#allocation2 + $0x3e8] sm:$0xff] }
 0x2d6   :  { %1535 = vmatprep.subr.bf16.mxu1 %v1646_v0  ;;  %v1584_v35 = vpack.c.bf16 %v727_v34, %v726_v33 }
 0x2d9   :  { %1537 = vmatpush3.bf16.msra.mxu1 %v1536_v37 }
 0x2da   :  { %1538 = vmatprep.subr.bf16.mxu1 %v1646_v0 }
 0x2dd   :  { %1540 = vmatpush3.bf16.msra.mxu1 %v1539_v46  ;;  %v813_v46 = vld [vmem:[#allocation2 + $0x408] sm:$0xff] }
 0x2de   :  { %1565 = vmatprep.subr.bf16.mxu1 %v1646_v0  ;;  %v1590_v48 = vpack.c.bf16 %v813_v46, %v812_v45 }
 0x393   :  { %v412_v39 = vpop.f32.mrb[2].mxu1 }
 0x394   :  { %v413_v40 = vadd.f32 %v918_v38, %v412_v39  ;;  %v1221_v41 = vpop.f32.mrb[3].mxu1 }
 0x396   :  { %vm416_vm4 = vcmp.gt.f32.partialorder %v413_v40, 0.0  ;;  %v417_v42 = vmul.f32 0.01, %v413_v40 }
 0x398   :  { %v418_v43 = vsel %vm416_vm4, %v413_v40, %v417_v42  ;;  %v728_v42 = vld [vmem:[#allocation2 + $0x3f0] sm:$0xff] }
 0x399   :  { %1255 = vmatmul.mubr.f32.vlgmr.msra.gmra.mrb[4].mxu0 %v418_v43  ;;  %v729_v43 = vld [vmem:[#allocation2 + $0x3f8] sm:$0xff] }
 0x39a   :  { %1324 = vmatprep.mubr.msk.f32.mxu0 %vm1647_vm0, %v1648_v1  ;;  %1543 = vmatpush3.bf16.msra.mxu0 %v1542_v50  ;;  %v1587_v44 = vpack.c.bf16 %v729_v43, %v728_v42  ;;  %v1593_v50 = vpack.c.bf16 %v815_v49, %v814_v47 }
 0x39b   :  { %1544 = vmatprep.subr.bf16.mxu0 %v1646_v0 }
 0x39e   :  { %1546 = vmatpush3.bf16.msra.mxu0 %v1545_v52  ;;  %v817_v52 = vld [vmem:[#allocation2 + $0x428] sm:$0xff] }
 0x39f   :  { %1547 = vmatprep.subr.bf16.mxu0 %v1646_v0  ;;  %v1596_v53 = vpack.c.bf16 %v817_v52, %v816_v51 }
 0x3a2   :  { %1549 = vmatpush3.bf16.msra.mxu0 %v1548_v55 }
 0x3a3   :  { %1550 = vmatprep.subr.bf16.mxu0 %v1646_v0 }
 0x3a6   :  { %1552 = vmatpush3.bf16.msra.mxu0 %v1551_v58  ;;  %v1602_v58 = vpack.c.bf16 %v821_v57, %v820_v56 }
 0x3a7   :  { %1553 = vmatprep.subr.bf16.mxu0 %v1646_v0 }
 0x3aa   :  { %1555 = vmatpush3.bf16.msra.mxu0 %v1554_v61  ;;  %v1605_v61 = vpack.c.bf16 %v823_v60, %v822_v59 }
 0x3ab   :  { %1556 = vmatprep.subr.bf16.mxu0 %v1646_v0 }
 0x3ae   :  { %1558 = vmatpush3.bf16.msra.mxu0 %v1557_v2  ;;  %v1608_v2 = vpack.c.bf16 %v825_v63, %v824_v62 }
 0x3af   :  { %1559 = vmatprep.subr.bf16.mxu0 %v1646_v0 }
 0x3b2   :  { %1561 = vmatpush3.bf16.msra.mxu0 %v1560_v5 }
 0x3b3   :  { %1562 = vmatprep.subr.bf16.mxu0 %v1646_v0 }
 0x3b6   :  { %1564 = vmatpush3.bf16.msra.mxu0 %v1563_v14 }
 0x3b7   :  { %1589 = vmatprep.subr.bf16.mxu0 %v1646_v0 }
 0x46c   :  { %v510_v7 = vpop.f32.mrb[4].mxu0 }
 0x46d   :  { %v511_v8 = vadd.f32 %v920_v6, %v510_v7  ;;  %v1256_v9 = vpop.f32.mrb[5].mxu0 }
 0x46e   :  { %v826_v9 = vld [vmem:[#allocation2 + $0x470] sm:$0xff] }
 0x46f   :  { %vm514_vm5 = vcmp.gt.f32.partialorder %v511_v8, 0.0  ;;  %v515_v10 = vmul.f32 0.01, %v511_v8 }
 0x471   :  { %v516_v11 = vsel %vm514_vm5, %v511_v8, %v515_v10  ;;  %v827_v10 = vld [vmem:[#allocation2 + $0x478] sm:$0xff] }
 0x472   :  { %1290 = vmatmul.mubr.f32.vlgmr.msra.gmra.mrb[4].mxu1 %v516_v11  ;;  %v1611_v11 = vpack.c.bf16 %v827_v10, %v826_v9 }
 0x473   :  { %1359 = vmatprep.mubr.msk.f32.mxu1 %vm1647_vm0, %v1648_v1  ;;  %1567 = vmatpush3.bf16.msra.mxu1 %v1566_v18 }
 0x474   :  { %1568 = vmatprep.subr.bf16.mxu1 %v1646_v0 }
 0x477   :  { %1570 = vmatpush3.bf16.msra.mxu1 %v1569_v20 }
 0x478   :  { %1571 = vmatprep.subr.bf16.mxu1 %v1646_v0 }
 0x47b   :  { %1573 = vmatpush3.bf16.msra.mxu1 %v1572_v23 }
 0x47c   :  { %1574 = vmatprep.subr.bf16.mxu1 %v1646_v0 }
 0x47f   :  { %1576 = vmatpush3.bf16.msra.mxu1 %v1575_v26 }
 0x480   :  { %1577 = vmatprep.subr.bf16.mxu1 %v1646_v0 }
 0x483   :  { %1579 = vmatpush3.bf16.msra.mxu1 %v1578_v29 }
 0x484   :  { %1580 = vmatprep.subr.bf16.mxu1 %v1646_v0 }
 0x487   :  { %1582 = vmatpush3.bf16.msra.mxu1 %v1581_v32 }
 0x488   :  { %1583 = vmatprep.subr.bf16.mxu1 %v1646_v0 }
 0x48b   :  { %1585 = vmatpush3.bf16.msra.mxu1 %v1584_v35 }
 0x48c   :  { %1586 = vmatprep.subr.bf16.mxu1 %v1646_v0 }
 0x48f   :  { %1588 = vmatpush3.bf16.msra.mxu1 %v1587_v44 }
 0x545   :  { %v608_v37 = vpop.f32.mrb[4].mxu1 }
 0x546   :  { %v609_v38 = vadd.f32 %v922_v36, %v608_v37  ;;  %v1291_v39 = vpop.f32.mrb[5].mxu1 }
 0x548   :  { %vm612_vm6 = vcmp.gt.f32.partialorder %v609_v38, 0.0  ;;  %v613_v40 = vmul.f32 0.01, %v609_v38 }
 0x54a   :  { %v614_v41 = vsel %vm612_vm6, %v609_v38, %v613_v40 }
 0x54b   :  { %1325 = vmatmul.mubr.f32.vlgmr.msra.gmra.mrb[6].mxu0 %v614_v41 }
 0x54c   :  { %1394 = vmatprep.mubr.msk.f32.mxu0 %vm1647_vm0, %v1648_v1  ;;  %1591 = vmatpush3.bf16.msra.mxu0 %v1590_v48  ;;  %v818_v1 = vld [vmem:[#allocation2 + $0x430] sm:$0xff] }
 0x54d   :  { %1592 = vmatprep.subr.bf16.mxu0 %v1646_v0  ;;  %v1599_v55 = vpack.c.bf16 %v819_v54, %v818_v1 }
 0x550   :  { %1594 = vmatpush3.bf16.msra.mxu0 %v1593_v50 }
 0x551   :  { %1595 = vmatprep.subr.bf16.mxu0 %v1646_v0 }
 0x554   :  { %1597 = vmatpush3.bf16.msra.mxu0 %v1596_v53 }
 0x555   :  { %1598 = vmatprep.subr.bf16.mxu0 %v1646_v0 }
 0x558   :  { %1600 = vmatpush3.bf16.msra.mxu0 %v1599_v55 }
 0x559   :  { %1601 = vmatprep.subr.bf16.mxu0 %v1646_v0 }
 0x55c   :  { %1603 = vmatpush3.bf16.msra.mxu0 %v1602_v58 }
 0x55d   :  { %1604 = vmatprep.subr.bf16.mxu0 %v1646_v0 }
 0x560   :  { %1606 = vmatpush3.bf16.msra.mxu0 %v1605_v61 }
 0x561   :  { %1607 = vmatprep.subr.bf16.mxu0 %v1646_v0 }
 0x564   :  { %1609 = vmatpush3.bf16.msra.mxu0 %v1608_v2 }
 0x565   :  { %1610 = vmatprep.subr.bf16.mxu0 %v1646_v0 }
 0x568   :  { %1612 = vmatpush3.bf16.msra.mxu0 %v1611_v11 }
 0x61e   :  { %v706_v4 = vpop.f32.mrb[6].mxu0 }
 0x61f   :  { %v707_v5 = vadd.f32 %v924_v3, %v706_v4  ;;  %v1326_v6 = vpop.f32.mrb[7].mxu0 }
 0x621   :  { %vm710_vm7 = vcmp.gt.f32.partialorder %v707_v5, 0.0  ;;  %v711_v7 = vmul.f32 0.01, %v707_v5 }
 0x623   :  { %v712_v8 = vsel %vm710_vm7, %v707_v5, %v711_v7 }
 0x624   :  { %1360 = vmatmul.mubr.f32.vlgmr.msra.gmra.mrb[6].mxu1 %v712_v8 }
 0x6f7   :  { %v804_v0 = vpop.f32.mrb[6].mxu1 }
 0x6f8   :  { %v805_v13 = vadd.f32 %v926_v12, %v804_v0  ;;  %v1361_v14 = vpop.f32.mrb[7].mxu1 }
 0x6fa   :  { %vm808_vm8 = vcmp.gt.f32.partialorder %v805_v13, 0.0  ;;  %v809_v15 = vmul.f32 0.01, %v805_v13 }
 0x6fc   :  { %v810_v16 = vsel %vm808_vm8, %v805_v13, %v809_v15 }
 0x6fd   :  { %1395 = vmatmul.mubr.f32.vlgmr.msra.gmra.mrb[8].mxu0 %v810_v16 }
 0x7d0   :  { %v902_v18 = vpop.f32.mrb[8].mxu0 }
 0x7d1   :  { %v903_v19 = vadd.f32 %v928_v17, %v902_v18  ;;  %v1396_v20 = vpop.f32.mrb[9].mxu0 }
 0x7d3   :  { %906 = vst [vmem:[%s1807_s3] sm:$0xff] %v903_v19 }
 0x7d4   :  { %911 = vsyncpa [#allocation3], 1 }

</bundles_post_ra>
